<compile_context>
chip_gen: v7x
topology: tpu7x:2x2x1
jax: 0.10.0
libtpu: 0.0.40
codegen_flags: <defaults>
</compile_context>

<pallas_src>
import jax
import jax.numpy as jnp
from jax.experimental import pallas as pl
from jax.experimental.pallas import tpu as pltpu


def _head_kernel(seq_ref, pool_ref, wprj_ref, bprj_ref, wfin_ref, bfin_ref,
                 out_ref):
    """Fully-fused per-batch-element head.

    seq_ref : (1, S, H) f32   encoder sequence output (this batch element)
    pool_ref: (1, 1, H) f32   encoder [CLS] of the intent pass
    wprj_ref: (H, H) f32      cls_prj weight, (in, out) layout (pre-transposed)
    bprj_ref: (1, H) f32      cls_prj bias
    wfin_ref: (H, 2) f32      cls_final weight, (in, out) layout
    bfin_ref: (1, 2) f32      cls_final bias
    out_ref : (1, 1, 2) f32   logits for this batch element
    """
    x = seq_ref[0]                               # (S, H) f32
    q = x[0:2, :]                                # (2, H); only ctx rows 0/1 are consumed

    # sim rows 0..1 of seq @ seq^T  -> (2, S), f32 accumulation on the MXU.
    sim = jax.lax.dot_general(
        q, x, (((1,), (1,)), ((), ())), preferred_element_type=jnp.float32)

    # Numerically-stable softmax over the last dim (exact division: the kernel
    # is HBM-bound, so VPU/EUP cycles are free).
    m = jnp.max(sim, axis=-1, keepdims=True)
    e = jnp.exp(sim - m)
    attn = e / jnp.sum(e, axis=-1, keepdims=True)

    # ctx rows 0..1 = attn(2,S) @ seq(S,H)  -> (2, H) f32.
    ctx = jnp.dot(attn, x, preferred_element_type=jnp.float32)

    pooled = ctx[0:1, :] + ctx[1:2, :] + pool_ref[0]      # (1, H)

    # cls_prj -> cls_dropout (identity at inference) -> cls_final.
    h = jnp.dot(pooled, wprj_ref[...],
                preferred_element_type=jnp.float32) + bprj_ref[...]     # (1, H)
    logits = jnp.dot(h, wfin_ref[...],
                     preferred_element_type=jnp.float32) + bfin_ref[...]  # (1, 2)

    out_ref[0] = logits.astype(out_ref.dtype)


def bert_model_head(bert_sequence_output, bert_pool_output,
                    w_prj, b_prj, w_fin, b_fin):
    """bert_sequence_output: [B, S, H] f32, bert_pool_output: [B, H] f32.
    w_prj: [H, H] (PyTorch out,in), b_prj: [H]; w_fin: [2, H], b_fin: [2].
    Returns logits [B, 2] f32."""
    B, S, H = bert_sequence_output.shape

    pool3 = bert_pool_output.reshape(B, 1, H)

    # Load-time transposes of constant weights: PyTorch (out, in) -> (in, out)
    # so the in-kernel dots are plain row-major matmuls.
    wprj_t = jnp.transpose(w_prj)            # (H, H)
    wfin_t = jnp.transpose(w_fin)            # (H, 2)
    bprj2 = b_prj.reshape(1, H)
    bfin2 = b_fin.reshape(1, 2)

    # Advisory cost estimate: the call is dominated by the f32 [B,S,H] read.
    flops = int(B * (8 * S * H + 2 * H * H + 4 * H))
    transcendentals = int(B * 2 * S)
    bytes_accessed = int(4 * (B * S * H + B * H + H * H + 3 * H + 2 + 2 * B))

    out = pl.pallas_call(
        _head_kernel,
        out_shape=jax.ShapeDtypeStruct((B, 1, 2), jnp.float32),
        grid=(B,),
        in_specs=[
            pl.BlockSpec((1, S, H), lambda b: (b, 0, 0)),   # sequence output (streamed)
            pl.BlockSpec((1, 1, H), lambda b: (b, 0, 0)),   # intent [CLS] pool
            pl.BlockSpec((H, H), lambda b: (0, 0)),         # cls_prj weight (resident)
            pl.BlockSpec((1, H), lambda b: (0, 0)),         # cls_prj bias   (resident)
            pl.BlockSpec((H, 2), lambda b: (0, 0)),         # cls_final weight (resident)
            pl.BlockSpec((1, 2), lambda b: (0, 0)),         # cls_final bias (resident)
        ],
        out_specs=pl.BlockSpec((1, 1, 2), lambda b: (b, 0, 0)),
        compiler_params=pltpu.CompilerParams(
            # Batch axis parallel -> shards the HBM stream across both TCs on v7x;
            # harmless (near-zero impact) on single-TC v5e/v6e.
            dimension_semantics=("parallel",),
            # Headroom for production sizes (H>=768, S>=512); safe on every
            # generation (<= scoped default on v6e/v7x, < physical on v5e).
            vmem_limit_bytes=32 << 20),
        cost_estimate=pl.CostEstimate(
            flops=flops,
            transcendentals=transcendentals,
            bytes_accessed=bytes_accessed),
    )(bert_sequence_output, pool3, wprj_t, bprj2, wfin_t, bfin2)

    return out.reshape(B, 2)


def _reference(seq, pool, w_prj, b_prj, w_fin, b_fin):
    # Pure-f32 reference with full module semantics (full S x S attention).
    sim = jnp.einsum('bsh,bth->bst', seq, seq)
    attn = jax.nn.softmax(sim, axis=-1)
    ctx = jnp.einsum('bst,bth->bsh', attn, seq)
    pooled = ctx[:, 0] + ctx[:, 1] + pool
    h = pooled @ w_prj.T + b_prj
    return h @ w_fin.T + b_fin


if __name__ == "__main__":
    B, S, H = 2, 8, 32   # batch, seq_len, hidden_size

    key = jax.random.PRNGKey(0)
    k_seq, k_pool, k_wp, k_bp, k_wf, k_bf = jax.random.split(key, 6)

    # Stand-ins for the BERT encoder outputs (deterministic).
    bert_sequence_output = jax.random.normal(k_seq, (B, S, H), jnp.float32)
    bert_seq_output = jax.random.normal(k_pool, (B, S, H), jnp.float32)
    bert_pool_output = bert_seq_output[:, 0, :]                   # [B, H]

    # Deterministic head parameters (cls_prj: H->H, cls_final: H->2).
    w_prj = 0.05 * jax.random.normal(k_wp, (H, H), jnp.float32)
    b_prj = 0.01 * jax.random.normal(k_bp, (H,), jnp.float32)
    w_fin = 0.05 * jax.random.normal(k_wf, (2, H), jnp.float32)
    b_fin = 0.01 * jax.random.normal(k_bf, (2,), jnp.float32)

    logits = bert_model_head(bert_sequence_output, bert_pool_output,
                             w_prj, b_prj, w_fin, b_fin)
    jax.block_until_ready(logits)

    ref = _reference(bert_sequence_output, bert_pool_output,
                     w_prj, b_prj, w_fin, b_fin)
    assert logits.shape == (B, 2)
    # Full-f32 path (f32 MXU accumulation, exact softmax) -> tight tolerance.
    assert jnp.allclose(logits, ref, atol=1e-2, rtol=1e-2), (logits, ref)

    print("KERNEL_OK")
</pallas_src>

<mosaic_0001>
module attributes {stable_mosaic.version = 11 : i64} {
  func.func @_head_kernel(%arg0: i32, %arg1: memref<1x8x32xf32, #tpu.memory_space<vmem>>, %arg2: memref<1x1x32xf32, #tpu.memory_space<vmem>>, %arg3: memref<32x32xf32, #tpu.memory_space<vmem>>, %arg4: memref<1x32xf32, #tpu.memory_space<vmem>>, %arg5: memref<32x2xf32, #tpu.memory_space<vmem>>, %arg6: memref<1x2xf32, #tpu.memory_space<vmem>>, %arg7: memref<1x1x2xf32, #tpu.memory_space<vmem>>) attributes {dimension_semantics = [#tpu.dimension_semantics<parallel>], iteration_bounds = array<i64: 2>, scalar_prefetch = 0 : i64, scratch_operands = 0 : i64, tpu.core_type = #tpu.core_type<tc>, window_params = [{transform_indices = @transform_0, window_bounds = array<i64: 1, 8, 32>}, {transform_indices = @transform_1, window_bounds = array<i64: 1, 1, 32>}, {pipeline_mode = #tpu.pipeline_mode<synchronous>, transform_indices = @transform_2, window_bounds = array<i64: 32, 32>}, {pipeline_mode = #tpu.pipeline_mode<synchronous>, transform_indices = @transform_3, window_bounds = array<i64: 1, 32>}, {pipeline_mode = #tpu.pipeline_mode<synchronous>, transform_indices = @transform_4, window_bounds = array<i64: 32, 2>}, {pipeline_mode = #tpu.pipeline_mode<synchronous>, transform_indices = @transform_5, window_bounds = array<i64: 1, 2>}, {transform_indices = @transform_6, window_bounds = array<i64: 1, 1, 2>}]} {
    %c0 = arith.constant 0 : index
    %c0_0 = arith.constant 0 : index
    %c0_1 = arith.constant 0 : index
    %0 = vector.load %arg1[%c0, %c0_0, %c0_1] : memref<1x8x32xf32, #tpu.memory_space<vmem>>, vector<1x8x32xf32>
    %1 = vector.shape_cast %0 : vector<1x8x32xf32> to vector<8x32xf32>
    %2 = vector.extract_strided_slice %1 {offsets = [0, 0], sizes = [2, 32], strides = [1, 1]} : vector<8x32xf32> to vector<2x32xf32>
    %cst = arith.constant dense<0.000000e+00> : vector<2x8xf32>
    %3 = tpu.matmul %2, %1, %cst {dimension_numbers = #tpu.dot_dimension_numbers<[1], [1], [0], [0], [0, 0, 1, 0], [], []>} : vector<2x32xf32>, vector<8x32xf32>, vector<2x8xf32> -> vector<2x8xf32>
    %cst_2 = arith.constant dense<0xFF800000> : vector<2xf32>
    %4 = vector.multi_reduction <maximumf>, %3, %cst_2 [1] : vector<2x8xf32> to vector<2xf32>
    %5 = vector.shape_cast %4 : vector<2xf32> to vector<2x1xf32>
    %6 = vector.broadcast %5 : vector<2x1xf32> to vector<2x8xf32>
    %7 = arith.subf %3, %6 : vector<2x8xf32>
    %8 = math.exp %7 : vector<2x8xf32>
    %cst_3 = arith.constant dense<0.000000e+00> : vector<2xf32>
    %9 = vector.multi_reduction <add>, %8, %cst_3 [1] : vector<2x8xf32> to vector<2xf32>
    %10 = vector.shape_cast %9 : vector<2xf32> to vector<2x1xf32>
    %11 = vector.broadcast %10 : vector<2x1xf32> to vector<2x8xf32>
    %12 = arith.divf %8, %11 : vector<2x8xf32>
    %cst_4 = arith.constant dense<0.000000e+00> : vector<2x32xf32>
    %13 = tpu.matmul %12, %1, %cst_4 {dimension_numbers = #tpu.dot_dimension_numbers<[1], [0], [0], [1], [0, 0, 1, 1], [], []>} : vector<2x8xf32>, vector<8x32xf32>, vector<2x32xf32> -> vector<2x32xf32>
    %14 = vector.extract_strided_slice %13 {offsets = [0, 0], sizes = [1, 32], strides = [1, 1]} : vector<2x32xf32> to vector<1x32xf32>
    %15 = vector.extract_strided_slice %13 {offsets = [1, 0], sizes = [1, 32], strides = [1, 1]} : vector<2x32xf32> to vector<1x32xf32>
    %16 = arith.addf %14, %15 : vector<1x32xf32>
    %c0_5 = arith.constant 0 : index
    %c0_6 = arith.constant 0 : index
    %c0_7 = arith.constant 0 : index
    %17 = vector.load %arg2[%c0_5, %c0_6, %c0_7] : memref<1x1x32xf32, #tpu.memory_space<vmem>>, vector<1x1x32xf32>
    %18 = vector.shape_cast %17 : vector<1x1x32xf32> to vector<1x32xf32>
    %19 = arith.addf %16, %18 : vector<1x32xf32>
    %c0_8 = arith.constant 0 : index
    %c0_9 = arith.constant 0 : index
    %20 = vector.load %arg3[%c0_8, %c0_9] : memref<32x32xf32, #tpu.memory_space<vmem>>, vector<32x32xf32>
    %cst_10 = arith.constant dense<0.000000e+00> : vector<1x32xf32>
    %21 = tpu.matmul %19, %20, %cst_10 {dimension_numbers = #tpu.dot_dimension_numbers<[1], [0], [0], [1], [0, 0, 1, 1], [], []>} : vector<1x32xf32>, vector<32x32xf32>, vector<1x32xf32> -> vector<1x32xf32>
    %c0_11 = arith.constant 0 : index
    %c0_12 = arith.constant 0 : index
    %22 = vector.load %arg4[%c0_11, %c0_12] : memref<1x32xf32, #tpu.memory_space<vmem>>, vector<1x32xf32>
    %23 = arith.addf %21, %22 : vector<1x32xf32>
    %c0_13 = arith.constant 0 : index
    %c0_14 = arith.constant 0 : index
    %24 = vector.load %arg5[%c0_13, %c0_14] : memref<32x2xf32, #tpu.memory_space<vmem>>, vector<32x2xf32>
    %cst_15 = arith.constant dense<0.000000e+00> : vector<1x2xf32>
    %25 = tpu.matmul %23, %24, %cst_15 {dimension_numbers = #tpu.dot_dimension_numbers<[1], [0], [0], [1], [0, 0, 1, 1], [], []>} : vector<1x32xf32>, vector<32x2xf32>, vector<1x2xf32> -> vector<1x2xf32>
    %c0_16 = arith.constant 0 : index
    %c0_17 = arith.constant 0 : index
    %26 = vector.load %arg6[%c0_16, %c0_17] : memref<1x2xf32, #tpu.memory_space<vmem>>, vector<1x2xf32>
    %27 = arith.addf %25, %26 : vector<1x2xf32>
    %c0_18 = arith.constant 0 : index
    %c0_19 = arith.constant 0 : index
    %c0_20 = arith.constant 0 : index
    %28 = vector.load %arg7[%c0_18, %c0_19, %c0_20] : memref<1x1x2xf32, #tpu.memory_space<vmem>>, vector<1x1x2xf32>
    %29 = vector.shape_cast %28 : vector<1x1x2xf32> to vector<1x2xf32>
    %30 = vector.shape_cast %27 : vector<1x2xf32> to vector<1x1x2xf32>
    tpu.vector_store %arg7[%c0_18, %c0_19, %c0_20], %30 {strides = array<i32>} : memref<1x1x2xf32, #tpu.memory_space<vmem>>, vector<1x1x2xf32>,
    return
  }
  func.func @transform_0(%arg0: i32) -> (i32, i32, i32) {
    %c0_i32 = arith.constant 0 : i32
    %c0_i32_0 = arith.constant 0 : i32
    %c0_i32_1 = arith.constant 0 : i32
    return %arg0, %c0_i32, %c0_i32_0 : i32, i32, i32
  }
  func.func @transform_1(%arg0: i32) -> (i32, i32, i32) {
    %c0_i32 = arith.constant 0 : i32
    %c0_i32_0 = arith.constant 0 : i32
    %c0_i32_1 = arith.constant 0 : i32
    return %arg0, %c0_i32, %c0_i32_0 : i32, i32, i32
  }
  func.func @transform_2(%arg0: i32) -> (i32, i32) {
    %c0_i32 = arith.constant 0 : i32
    %c0_i32_0 = arith.constant 0 : i32
    %c0_i32_1 = arith.constant 0 : i32
    return %c0_i32, %c0_i32_0 : i32, i32
  }
  func.func @transform_3(%arg0: i32) -> (i32, i32) {
    %c0_i32 = arith.constant 0 : i32
    %c0_i32_0 = arith.constant 0 : i32
    %c0_i32_1 = arith.constant 0 : i32
    return %c0_i32, %c0_i32_0 : i32, i32
  }
  func.func @transform_4(%arg0: i32) -> (i32, i32) {
    %c0_i32 = arith.constant 0 : i32
    %c0_i32_0 = arith.constant 0 : i32
    %c0_i32_1 = arith.constant 0 : i32
    return %c0_i32, %c0_i32_0 : i32, i32
  }
  func.func @transform_5(%arg0: i32) -> (i32, i32) {
    %c0_i32 = arith.constant 0 : i32
    %c0_i32_0 = arith.constant 0 : i32
    %c0_i32_1 = arith.constant 0 : i32
    return %c0_i32, %c0_i32_0 : i32, i32
  }
  func.func @transform_6(%arg0: i32) -> (i32, i32, i32) {
    %c0_i32 = arith.constant 0 : i32
    %c0_i32_0 = arith.constant 0 : i32
    %c0_i32_1 = arith.constant 0 : i32
    return %arg0, %c0_i32, %c0_i32_0 : i32, i32, i32
  }
}

</mosaic_0001>

<bundles_post_ra>
// kernel: tpu_custom_call.1
= control target key start
LH: loop header
LB: loop body
LE: loop exit
PB: predicated region body
PF: predicated region fallthrough
CT: control target
= control target key end

     0   :  { %11 = vsyncpa [#allocation3], 0  ;;  %s1162_s0 = inlined_call_operand.hbm [shape: f32[2,8,32], index: 0, kind: input, shape index: {}]   ;;  %s1163_s1 = inlined_call_operand.vmem [shape: f32[2,1,32], index: 1, kind: input, shape index: {}]   ;;  %s1164_s2 = inlined_call_operand.vmem [shape: f32[32,32], index: 2, kind: input, shape index: {}]   ;;  %s1165_s3 = inlined_call_operand.vmem [shape: f32[1,32], index: 3, kind: input, shape index: {}]   ;;  %s1166_s4 = inlined_call_operand.vmem [shape: f32[32,2], index: 4, kind: input, shape index: {}]   ;;  %s1167_s5 = inlined_call_operand.vmem [shape: f32[1,2], index: 5, kind: input, shape index: {}]   ;;  %s1168_s6 = inlined_call_operand.hbm [shape: f32[2,1,2], index: 6, kind: output, shape index: {}]  }
   0x1   :  { %13 = vsyncpa [#allocation3 + $0x1], 0 }
   0x2   :  { %14 = vsyncpa [#allocation4], 0 }
   0x3   :  { %16 = vsyncpa [#allocation4 + $0x1], 0  ;;  %s957_s21 = smov 0   ;;  %s959_s22 = smov 0  }
   0x4   :  { %s961_s23 = smov 0   ;;  %s963_s24 = smov 0  }
   0x5 LB: > { %s978_s25 = sadd.s32 4294967295, %s915_s24   ;;  %s693_s26 = sadd.s32 4294967294, %s915_s24   ;;  %s915_s24 = sphi %s963_s24, %s1183_s24   ;;  %s911_s23 = sphi %s961_s23, %s1182_s23   ;;  %s907_s22 = sphi %s959_s22, %s1181_s22   ;;  %s903_s21 = sphi %s957_s21, %s1180_s21  }
   0x6   : > { %s982_s27 = sadd.s32 1, %s915_s24   ;;  %s29_s28 = sadd.s32 1, %s911_s23 }
   0x7   : > { %s26_s29 = ssub.s32 %s915_s24, %s982_s27  ;;  %p36_p0 = scmp.ne.s32.totalorder %s911_s23, %s907_s22 }
   0x8   : > { %p27_p1 = scmp.eq.s32.totalorder %s26_s29, 0  ;;  %p37_p2 = scmp.eq.s32.totalorder %s915_s24, 0 }
   0x9   : > { %p42_p3 = scmp.ne.s32.totalorder %s907_s22, %s903_s21  ;;  %p43_p4 = scmp.eq.s32.totalorder %s978_s25, 0 }
   0xa   : > { %s994_s30 = scalar_select %p27_p1, %s911_s23, %s29_s28  }
   0xb   : > { %p996_p5 = por %p37_p2, %p36_p0  ;;  %p1000_p6 = por %p43_p4, %p42_p3 }
   0xc   : > { %p176_p7 = scmp.eq.s32.totalorder %s978_s25, 1  ;;  %p182_p8 = scmp.eq.s32.totalorder %s693_s26, 1 }
   0xd   : > { %p778_p10 = scmp.lt.s32.totalorder %s915_s24, 2  ;;  %s214_s11 = sand.u32 1, %s911_s23  }
   0xe   : > { %p1007_p11 = por %p176_p7, %p36_p0  ;;  %p1011_p12 = por %p182_p8, %p42_p3 }
   0xf   : > { %s697_s12 = sshll.u32 %s915_s24, 7  ;;  %s696_s13 = sshll.u32 %s214_s11, 3 }
  0x10   : > { %s1172_s9 = scalar_select %p1007_p11, 1, 0 }
  0x11   : > { %s1173_s10 = scalar_select %p1011_p12, 1, 0 }
  0x12   : > { %s1020_s16 = scalar_lea.hbm %s1162_s0, %s697_s12  ;;  %s218_s17 = scalar_lea.vmem [#allocation2], %s696_s13 }
  0x13   : > { %s225_s18 = sshll.u32 %s218_s17, 4  ;;  %p1024_p13 = pnand %p778_p10, %p996_p5  ;;  %s1028_s18 = int_to_ptr.vmem [resolvable:$true] %s225_s18 }
  0x14   : > { %s215_s20 = scalar_lea.sflag [#allocation3], %s214_s11  ;;  %s819_s26 = scalar_lea.hbm %s1020_s16, 128 }
  0x15   : > { %p820_p2 = scmp.ne.s32.totalorder %s1020_s16, %s819_s26  ;;  %p821_p3 = pneg %p1024_p13 }
  0x16   : > { %s824_s7 = scalar_lea.hbm %s1162_s0, 256  ;;  %p825_p5 = scmp.lt.u32.totalorder %s1020_s16, %s1162_s0 }
  0x17   : > { %p822_p4 = pnand %p821_p3, %p820_p2  ;;  %p826_p8 = scmp.lt.u32.totalorder %s824_s7, %s819_s26 }
  0x18   : > { %p828_p9 = scmp.lt.u32.totalorder %s819_s26, %s1020_s16 }
  0x19   : > { %p823_p7 = pneg %p822_p4  ;;  %p827_p10 = por %p826_p8, %p825_p5 }
  0x1b   : > { %p829_p0 = por %p828_p9, %p827_p10 }
  0x1d   : > { %p830_p1 = pnand %p829_p0, %p823_p7 }
  0x1f   : > { %833 = shalt.err (!%p830_p1)
}
  0x20   : > { %s834_s11 = scalar_lea.vmem %s1028_s18, 128  ;;  %s917_s14 = smov [#allocation2]  }
  0x21   : > { %p835_p2 = scmp.ne.s32.totalorder %s1028_s18, %s834_s11  ;;  %s839_s15 = sshll.u32 %s917_s14, 4  ;;  %s840_s15 = int_to_ptr.vmem [resolvable:$false] %s839_s15 }
  0x22   : > { %s841_s17 = scalar_lea.vmem %s840_s15, 256  ;;  %p842_p11 = scmp.lt.s32.totalorder %s1028_s18, %s840_s15 }
  0x23   : > { %p837_p4 = pnand %p835_p2, %p821_p3  ;;  %p843_p5 = scmp.lt.s32.totalorder %s841_s17, %s834_s11 }
  0x25   : > { %p838_p12 = pneg %p837_p4  ;;  %p844_p8 = por %p843_p5, %p842_p11 }
  0x27   : > { %p845_p9 = pnand %p844_p8, %p838_p12 }
  0x29   : > { %848 = shalt.err (!%p845_p9)
}
  0x2a   : > { %773 = dma.hbm_to_vmem [thread:$0]  (!%p1024_p13), %s1020_s16, 128, %s1028_s18, %s215_s20  }
  0x2b   : > { %p1175_p0 = scmp.lt.s32.totalorder %s915_s24, 3  ;;  %p1176_p1 = scmp.ge.s32.totalorder %s915_s24, 1 }
  0x2d   : > { %p237_p3 = pnand %p1176_p1, %p1175_p0 }
  0x2e   : > { %s1062_s26 = sand.u32 (!%p237_p3), 1, %s907_s22  }
  0x2f   : > { %240 = sbr.rel (%p237_p3) target bundleno = 1247 (0x4df), region = 44  ;;  %s699_s28 = sshll.u32 (!%p237_p3), %s1062_s26, 3 }
  0x30   : > { %s243_s29 = scalar_lea.sflag (!%p237_p3), [#allocation3], %s1062_s26  ;;  %s246_s7 = scalar_lea.vmem (!%p237_p3), [#allocation2], %s699_s28 }
  0x36   : > { %894 = dma.done.wait (%p1000_p6), %s243_s29, 128  }
  0x37   : > { %896 = vsyncadd (%p1000_p6), %s243_s29, 4294967168  ;;  %v918_v0 = vmov 0.0   ;;  %vm919_vm0 = vmmov 0   ;;  %vm281_vm1 = vcmask 261120   ;;  %v280_v1 = vld [vmem:[%s246_s7] sm:$0xff]  ;;  %vm355_vm2 = vcmask 58368  }
  0x38   : > { %722 = vmatprep.subr.mxu0 %v918_v0  ;;  %724 = vmatprep.mubr.msk.f32.mxu0 %vm919_vm0, %v918_v0  ;;  %v920_v10 = vmov 0.0|0.0   ;;  %vm367_vm3 = vcmask 64512   ;;  %v447_v14 = vld [vmem:[%s1164_s2] sm:$0xff]  ;;  %v448_v15 = vld [vmem:[%s1164_s2 + $0x8] sm:$0xff]  ;;  %v449_v17 = vld [vmem:[%s1164_s2 + $0x10] sm:$0xff]  ;;  %p277_p6 = scmp.lt.s32.totalorder %s978_s25, 1 }
  0x39   : > { %727 = vmatprep.subr.mxu1 %v918_v0  ;;  %729 = vmatprep.mubr.msk.f32.mxu1 %vm919_vm0, %v918_v0  ;;  %v755_v16 = vpack.c.bf16 %v448_v15, %v447_v14  ;;  %v450_v18 = vld [vmem:[%s1164_s2 + $0x18] sm:$0xff]  ;;  %v525_v20 = vld [vmem:[%s1166_s4] sm:$0xff]  ;;  %v526_v21 = vld [vmem:[%s1166_s4 + $0x8] sm:$0xff]  ;;  %s705_s17 = sshll.u32 %s978_s25, 4  ;;  %s276_s28 = scalar_lea.vmem [#allocation5], %s1062_s26  ;;  %vm603_vm4 = vcmask 8192  }
  0x3a   : > { %723 = vmatpush3.xpose.msk.msra.mxu0 %vm281_vm1, %v280_v1  ;;  %728 = vmatpush3.msra.mxu1 %v280_v1  ;;  %v758_v19 = vpack.c.bf16 %v450_v18, %v449_v17  ;;  %v761_v22 = vpack.c.bf16 %v526_v21, %v525_v20  ;;  %s278_s29 = scalar_select %p277_p6, %s978_s25, 1  ;;  %v527_v29 = vld [vmem:[%s1166_s4 + $0x10] sm:$0xff]  ;;  %v528_v30 = vld [vmem:[%s1166_s4 + $0x18] sm:$0xff]  ;;  %v451_v32 = vld [vmem:[%s1165_s3] sm:$0x1] }
  0x3b   : > { %754 = vmatprep.subr.bf16.mxu1 %v920_v10  ;;  %760 = vmatprep.subr.bf16.mxu0 %v920_v10  ;;  %v764_v31 = vpack.c.bf16 %v528_v30, %v527_v29  ;;  %v529_v36 = vld [vmem:[%s1167_s5] sm:$0x1]  ;;  %s606_s18 = scalar_lea.sflag [#allocation4], %s1062_s26  ;;  %p1177_p12 = scmp.ne.s32.totalorder %s1172_s9, 0 }
  0x3c   : > { %s279_s16 = scalar_lea.vmem %s1163_s1, %s278_s29  ;;  %s618_s29 = sshll.u32 %s276_s28, 4  ;;  %s1120_s29 = int_to_ptr.vmem [resolvable:$true] %s618_s29 }
  0x3d   : > { %725 = vmatmul.mubr.msk.f32.vlgmr.msra.gmra.mrb[0].mxu0 %vm281_vm1, %v280_v1  ;;  %v445_v26 = vld [vmem:[%s279_s16] sm:$0x1]  ;;  %s1118_s16 = scalar_lea.hbm %s1168_s6, %s705_s17  ;;  %s849_s19 = scalar_lea.vmem %s1120_s29, 16 }
  0x3e   : > { %751 = vmatprep.mubr.msk.f32.mxu0 %vm919_vm0, %v918_v0  ;;  %762 = vmatpush3.bf16.msra.mxu0 %v761_v22  ;;  %p850_p11 = scmp.ne.s32.totalorder %s1120_s29, %s849_s19  ;;  %s921_s25 = smov [#allocation5]  }
  0x3f   : > { %763 = vmatprep.subr.bf16.mxu0 %v920_v10  ;;  %s853_s20 = sshll.u32 %s921_s25, 4  ;;  %s854_s20 = int_to_ptr.vmem [resolvable:$false] %s853_s20 }
  0x40   : > { %p851_p13 = pnand %p850_p11, %p1177_p12  ;;  %s855_s12 = scalar_lea.vmem %s854_s20, 32 }
  0x41   : > { %p856_p10 = scmp.lt.s32.totalorder %s1120_s29, %s854_s20  ;;  %p857_p2 = scmp.lt.s32.totalorder %s855_s12, %s849_s19 }
  0x42   : > { %765 = vmatpush3.bf16.msra.mxu0 %v764_v31  ;;  %p852_p7 = pneg %p851_p13 }
  0x43   : > { %p858_p4 = por %p857_p2, %p856_p10 }
  0x45   : > { %p859_p5 = pnand %p858_p4, %p852_p7 }
 0x110   : > { %v351_v2 = vpop.f32.mrb[0].mxu0 }
 0x111   : > { %v726_v3 = vpop.f32.mrb[1].mxu0  ;;  %v356_v4 = vsel %vm355_vm2, %v351_v2, -inf }
 0x112   : > { %357 = vmax.xlane.f32.xlu0 %v356_v4 }
 0x19f   : > { %v358_v5 = vpop.xlane.xlu0 %357 }
 0x1a0   : > { %v359_v6 = vsub.f32 %v351_v2, %v358_v5 }
 0x1a2   : > { %v360_v7 = vmul.f32 1.442695, %v359_v6 }
 0x1a4   : > { %815 = vpow2.f32 %v360_v7 }
 0x1ae   : > { %v816_v8 = vpop.eup %815 }
 0x1af   : > { %v362_v9 = vsel %vm355_vm2, %v816_v8, 0.0 }
 0x1b0   : > { %363 = vadd.xlane.f32.xlu0 %v362_v9 }
 0x23d   : > { %v364_v11 = vpop.xlane.xlu0 %363 }
 0x23e   : > { %817 = vrcp.f32 %v364_v11 }
 0x248   : > { %v818_v12 = vpop.eup %817 }
 0x249   : > { %v366_v13 = vmul.f32 %v818_v12, %v816_v8 }
 0x24b   : > { %730 = vmatmul.mubr.msk.f32.vlgmr.msra.gmra.mrb[0].mxu1 %vm367_vm3, %v366_v13 }
 0x24c   : > { %740 = vmatprep.mubr.msk.f32.mxu1 %vm919_vm0, %v918_v0  ;;  %756 = vmatpush3.bf16.msra.mxu1 %v755_v16 }
 0x24d   : > { %757 = vmatprep.subr.bf16.mxu1 %v920_v10 }
 0x250   : > { %759 = vmatpush3.bf16.msra.mxu1 %v758_v19 }
 0x31e   : > { %v437_v23 = vpop.f32.mrb[0].mxu1 }
 0x31f   : > { %v442_v24 = vrot.slane %v437_v23, 1  ;;  %v731_v25 = vpop.f32.mrb[1].mxu1 }
 0x321   : > { %v444_v27 = vadd.f32 %v442_v24, %v437_v23 }
 0x323   : > { %v446_v28 = vadd.f32 %v445_v26, %v444_v27 }
 0x325   : > { %741 = vmatmul.mubr.msk.f32.vlgmr.msra.gmra.mrb[2].mxu1 %vm281_vm1, %v446_v28 }
 0x3f8   : > { %v521_v33 = vpop.f32.mrb[2].mxu1 }
 0x3f9   : > { %v522_v34 = vadd.f32 %v521_v33, %v451_v32  ;;  %v742_v35 = vpop.f32.mrb[3].mxu1 }
 0x3fb   : > { %752 = vmatmul.mubr.msk.f32.vlgmr.msra.gmra.mrb[2].mxu0 %vm281_vm1, %v522_v34 }
 0x4ce   : > { %v599_v37 = vpop.f32.mrb[2].mxu0 }
 0x4cf   : > { %v600_v38 = vadd.f32 %v599_v37, %v529_v36  ;;  %v753_v39 = vpop.f32.mrb[3].mxu0 }
 0x4d1   : > { %604 = vst.msk [vmem:[%s276_s28] sm:$0x1] %vm603_vm4, %v600_v38 }
 0x4d2   : > { %862 = shalt.err (!%p859_p5)
}
 0x4d3   : > { %s863_s26 = scalar_lea.hbm %s1118_s16, 16  ;;  %s867_s14 = scalar_lea.hbm %s1168_s6, 32 }
 0x4d4   : > { %p864_p8 = scmp.ne.s32.totalorder %s1118_s16, %s863_s26  ;;  %p868_p1 = scmp.lt.u32.totalorder %s1118_s16, %s1168_s6 }
 0x4d5   : > { %p869_p3 = scmp.lt.u32.totalorder %s867_s14, %s863_s26  ;;  %p871_p11 = scmp.lt.u32.totalorder %s863_s26, %s1118_s16 }
 0x4d6   : > { %p865_p9 = pnand %p864_p8, %p1177_p12 }
 0x4d7   : > { %p870_p6 = por %p869_p3, %p868_p1 }
 0x4d8   : > { %p866_p0 = pneg %p865_p9 }
 0x4d9   : > { %p872_p13 = por %p871_p11, %p870_p6 }
 0x4db   : > { %p873_p7 = pnand %p872_p13, %p866_p0 }
 0x4dd   : > { %876 = shalt.err (!%p873_p7)
}
 0x4de   : > { %768 = dma.vmem_to_hbm [thread:$0]  (%p1177_p12), %s1120_s29, 16, %s1118_s16, %s606_s18  }
 0x4df PF: > { %s630_s28 = sand.u32 1, %s903_s21   ;;  %p1178_p10 = scmp.ne.s32.totalorder %s1173_s10, 0 }
 0x4e0   : > { %p1179_p2 = scmp.ge.s32.totalorder %s915_s24, 2  ;;  %s631_s7 = scalar_lea.sflag [#allocation4], %s630_s28 }
 0x4e2   : > { %p775_p4 = pnand %p1179_p2, %p1178_p10 }
 0x4e4   : > { %898 = dma.done.wait (!%p775_p4), %s631_s7, 16  }
 0x4e5   : > { %900 = vsyncadd (!%p775_p4), %s631_s7, 4294967280  ;;  %p19_p5 = scmp.ge.s32.totalorder %s982_s27, 4   ;;  %s1180_s21 = smov %s907_s22 }
 0x4e6   : > { %s1181_s22 = smov %s911_s23  ;;  %s1182_s23 = smov %s994_s30 }
 0x4e7   : > { %s1183_s24 = smov %s982_s27  ;;  %21 = sbr.rel (!%p19_p5) target bundleno = 5 (0x5), region = 92 }
 0x4ee   :  { %635 = vsyncpa [#allocation3], 1 }
 0x4ef   :  { %637 = vsyncpa [#allocation3 + $0x1], 1 }
 0x4f0   :  { %638 = vsyncpa [#allocation4], 1 }
 0x4f1   :  { %640 = vsyncpa [#allocation4 + $0x1], 1 }

</bundles_post_ra>
